<compile_context>
chip_gen: v5e
topology: v5e:2x2
jax: 0.10.0
libtpu: 0.0.40
codegen_flags: <defaults>
</compile_context>

<pallas_src>
import jax
import jax.numpy as jnp
from jax.experimental import pallas as pl
from jax.experimental.pallas import tpu as pltpu


# --------------------------------------------------------------------------
# Pallas kernel
# --------------------------------------------------------------------------

def _adbn_kernel(x_ref, scale_ref, bias_ref, o_ref):
    # x_ref block: (1, 2, bc, hwb); scale/bias blocks: (bc, 1); out block: (1, bc, hwb)
    # f32 compute path is kept unconditionally (safe on v5e's non-bf16 VALU; the kernel
    # is HBM-bound so the upcast is hidden).
    x0 = x_ref[0, 0].astype(jnp.float32)
    x1 = x_ref[0, 1].astype(jnp.float32)
    d = jnp.abs(x0 - x1)
    o_ref[0] = (d * scale_ref[...] + bias_ref[...]).astype(o_ref.dtype)


# --------------------------------------------------------------------------
# Tiling / VMEM budgeting
# --------------------------------------------------------------------------

def _vmem_budgets():
    """(tile_budget_bytes, vmem_limit_bytes) derived from the chip's physical VMEM."""
    try:
        cap = int(pltpu.get_tpu_info().vmem_capacity_bytes)
    except Exception:
        cap = 64 * 1024 * 1024  # conservative (v7x-sized) fallback
    # Tile budget ~ half of physical VMEM minus headroom for internal scratch.
    tile_budget = max(8 << 20, min(48 << 20, cap // 2 - (8 << 20)))
    vmem_limit = max(tile_budget + (16 << 20), min(cap - (16 << 20), tile_budget + (32 << 20)))
    return tile_budget, vmem_limit


def _largest_divisor_multiple(n, mult, cap):
    """Largest divisor of n that is a multiple of `mult` and <= cap (0 if none)."""
    d = (min(cap, n) // mult) * mult
    while d >= mult:
        if n % d == 0:
            return d
        d -= mult
    return 0


def _choose_tiles(B, C, HW, itemsize, tile_budget):
    """Pick (bc, hwb) for blocks (1, 2, bc, hwb) in / (1, bc, hwb) out.

    Double-buffered VMEM footprint ~= 6 * bc * hwb * itemsize
    (input 2*bc*hwb x2 buffers + output bc*hwb x2 buffers).
    Last two block dims must each be a multiple of the native tile or the full extent.
    """
    # Native sublane packing: 8 for 4-byte, 16 for 2-byte, 32 for 1-byte dtypes.
    sub = max(8, 32 // max(1, itemsize))

    # ---- lane (H*W) tile ----
    if HW % 128 != 0:
        hwb = HW  # full extent is the only legal option
    else:
        # Largest 128-multiple divisor that fits the budget with the minimal channel tile.
        lane_cap = max(128, min(HW, (tile_budget // (6 * sub * itemsize)) // 128 * 128))
        hwb = _largest_divisor_multiple(HW, 128, lane_cap)
        if hwb == 0 or hwb < min(2048, HW):
            # Degenerate narrow lane tiles (~29% of roofline) -> use full H*W, tile channels.
            hwb = HW

    # ---- channel (sublane) tile ----
    max_rows = tile_budget // (6 * hwb * itemsize)
    if C % sub == 0:
        bc = _largest_divisor_multiple(C, sub, max(sub, max_rows))
        if bc == 0:
            bc = sub
    else:
        bc = C  # full extent required; hwb already carries the VMEM cap above

    # ---- v7x megacore balance: ensure >= 2 grid steps when cheaply possible ----
    if B * (C // bc) * (HW // hwb) < 2:
        if hwb == HW and HW % 256 == 0:
            hwb = HW // 2
        elif bc == C and C % (2 * sub) == 0:
            bc = C // 2

    return bc, hwb


# --------------------------------------------------------------------------
# Wrapper
# --------------------------------------------------------------------------

def adbn_forward(x, scale, bias):
    """x: (B, 2*C, H, W).  Returns BN(|x[:, :C] - x[:, C:]|) with folded scale/bias."""
    B, C2, H, W = x.shape
    assert C2 % 2 == 0
    C = C2 // 2
    HW = H * W

    xr = x.reshape(B, 2, C, HW)  # free reshape of the contiguous NCHW tensor

    tile_budget, vmem_limit = _vmem_budgets()
    bc, hwb = _choose_tiles(B, C, HW, x.dtype.itemsize, tile_budget)
    grid = (B, C // bc, HW // hwb)

    out = pl.pallas_call(
        _adbn_kernel,
        out_shape=jax.ShapeDtypeStruct((B, C, HW), x.dtype),
        grid=grid,
        in_specs=[
            # both temporal slabs in one contiguous block -> single DMA per grid step
            pl.BlockSpec((1, 2, bc, hwb), lambda b, ci, hi: (b, 0, ci, hi)),
            # per-channel BN scale / bias, broadcast along the lane (H*W) axis
            pl.BlockSpec((bc, 1), lambda b, ci, hi: (ci, 0)),
            pl.BlockSpec((bc, 1), lambda b, ci, hi: (ci, 0)),
        ],
        out_specs=pl.BlockSpec((1, bc, hwb), lambda b, ci, hi: (b, ci, hi)),
        compiler_params=pltpu.CompilerParams(
            dimension_semantics=("parallel", "parallel", "parallel"),
            vmem_limit_bytes=int(vmem_limit)),
    )(xr, scale.reshape(C, 1).astype(jnp.float32), bias.reshape(C, 1).astype(jnp.float32))

    return out.reshape(B, C, H, W)


def fold_batchnorm(gamma, beta, running_mean, running_var, eps=1e-5):
    """Eval-mode BatchNorm2d folded to y = x * scale + bias."""
    scale = gamma / jnp.sqrt(running_var + eps)
    bias = beta - running_mean * scale
    return scale, bias


# --------------------------------------------------------------------------

if __name__ == "__main__":
    key = jax.random.PRNGKey(0)
    B, C, H, W = 2, 4, 16, 16                      # input has 2*C = 8 channels
    kx, kg, kb, km, kv = jax.random.split(key, 5)

    x = jax.random.normal(kx, (B, 2 * C, H, W), jnp.float32)
    gamma = jax.random.uniform(kg, (C,), jnp.float32, 0.5, 1.5)
    beta = 0.1 * jax.random.normal(kb, (C,), jnp.float32)
    running_mean = 0.1 * jax.random.normal(km, (C,), jnp.float32)
    running_var = jax.random.uniform(kv, (C,), jnp.float32, 0.5, 1.5)

    scale, bias = fold_batchnorm(gamma, beta, running_mean, running_var, eps=1e-5)

    out = adbn_forward(x, scale, bias)
    out = jax.block_until_ready(out)

    # Self-check against a pure-JAX reference (same eval-mode BN semantics).
    x0, x1 = x[:, :C], x[:, C:]
    ref = jnp.abs(x0 - x1) * scale.reshape(1, C, 1, 1) + bias.reshape(1, C, 1, 1)
    assert out.shape == (B, C, H, W), out.shape
    assert bool(jnp.all(jnp.isfinite(out)))
    assert bool(jnp.allclose(out, ref, atol=1e-5, rtol=1e-5))

    print("KERNEL_OK")
</pallas_src>

<mosaic_0001>
module attributes {stable_mosaic.version = 11 : i64} {
  func.func @_adbn_kernel(%arg0: i32, %arg1: i32, %arg2: i32, %arg3: memref<1x2x4x256xf32, #tpu.memory_space<vmem>>, %arg4: memref<4x1xf32, #tpu.memory_space<vmem>>, %arg5: memref<4x1xf32, #tpu.memory_space<vmem>>, %arg6: memref<1x4x256xf32, #tpu.memory_space<vmem>>) attributes {dimension_semantics = [#tpu.dimension_semantics<parallel>, #tpu.dimension_semantics<parallel>, #tpu.dimension_semantics<parallel>], iteration_bounds = array<i64: 2, 1, 1>, scalar_prefetch = 0 : i64, scratch_operands = 0 : i64, tpu.core_type = #tpu.core_type<tc>, window_params = [{transform_indices = @transform_0, window_bounds = array<i64: 1, 2, 4, 256>}, {transform_indices = @transform_1, window_bounds = array<i64: 4, 1>}, {transform_indices = @transform_2, window_bounds = array<i64: 4, 1>}, {transform_indices = @transform_3, window_bounds = array<i64: 1, 4, 256>}]} {
    %c0 = arith.constant 0 : index
    %c0_0 = arith.constant 0 : index
    %c0_1 = arith.constant 0 : index
    %c0_2 = arith.constant 0 : index
    %0 = vector.load %arg3[%c0, %c0_0, %c0_1, %c0_2] : memref<1x2x4x256xf32, #tpu.memory_space<vmem>>, vector<1x1x4x256xf32>
    %1 = vector.shape_cast %0 : vector<1x1x4x256xf32> to vector<4x256xf32>
    %c0_3 = arith.constant 0 : index
    %c1 = arith.constant 1 : index
    %c0_4 = arith.constant 0 : index
    %c0_5 = arith.constant 0 : index
    %2 = vector.load %arg3[%c0_3, %c1, %c0_4, %c0_5] : memref<1x2x4x256xf32, #tpu.memory_space<vmem>>, vector<1x1x4x256xf32>
    %3 = vector.shape_cast %2 : vector<1x1x4x256xf32> to vector<4x256xf32>
    %4 = arith.subf %1, %3 : vector<4x256xf32>
    %5 = math.absf %4 : vector<4x256xf32>
    %c0_6 = arith.constant 0 : index
    %c0_7 = arith.constant 0 : index
    %6 = vector.load %arg4[%c0_6, %c0_7] : memref<4x1xf32, #tpu.memory_space<vmem>>, vector<4x1xf32>
    %7 = vector.broadcast %6 : vector<4x1xf32> to vector<4x256xf32>
    %8 = arith.mulf %5, %7 : vector<4x256xf32>
    %c0_8 = arith.constant 0 : index
    %c0_9 = arith.constant 0 : index
    %9 = vector.load %arg5[%c0_8, %c0_9] : memref<4x1xf32, #tpu.memory_space<vmem>>, vector<4x1xf32>
    %10 = vector.broadcast %9 : vector<4x1xf32> to vector<4x256xf32>
    %11 = arith.addf %8, %10 : vector<4x256xf32>
    %c0_10 = arith.constant 0 : index
    %c0_11 = arith.constant 0 : index
    %c0_12 = arith.constant 0 : index
    %12 = vector.load %arg6[%c0_10, %c0_11, %c0_12] : memref<1x4x256xf32, #tpu.memory_space<vmem>>, vector<1x4x256xf32>
    %13 = vector.shape_cast %12 : vector<1x4x256xf32> to vector<4x256xf32>
    %14 = vector.shape_cast %11 : vector<4x256xf32> to vector<1x4x256xf32>
    tpu.vector_store %arg6[%c0_10, %c0_11, %c0_12], %14 {strides = array<i32>} : memref<1x4x256xf32, #tpu.memory_space<vmem>>, vector<1x4x256xf32>,
    return
  }
  func.func @transform_0(%arg0: i32, %arg1: i32, %arg2: i32) -> (i32, i32, i32, i32) {
    %c0_i32 = arith.constant 0 : i32
    %c0_i32_0 = arith.constant 0 : i32
    return %arg0, %c0_i32, %arg1, %arg2 : i32, i32, i32, i32
  }
  func.func @transform_1(%arg0: i32, %arg1: i32, %arg2: i32) -> (i32, i32) {
    %c0_i32 = arith.constant 0 : i32
    %c0_i32_0 = arith.constant 0 : i32
    return %arg1, %c0_i32 : i32, i32
  }
  func.func @transform_2(%arg0: i32, %arg1: i32, %arg2: i32) -> (i32, i32) {
    %c0_i32 = arith.constant 0 : i32
    %c0_i32_0 = arith.constant 0 : i32
    return %arg1, %c0_i32 : i32, i32
  }
  func.func @transform_3(%arg0: i32, %arg1: i32, %arg2: i32) -> (i32, i32, i32) {
    %c0_i32 = arith.constant 0 : i32
    return %arg0, %arg1, %arg2 : i32, i32, i32
  }
}

</mosaic_0001>

<bundles_post_ra>
// kernel: tpu_custom_call.1
= control target key start
LH: loop header
LB: loop body
LE: loop exit
PB: predicated region body
PF: predicated region fallthrough
CT: control target
= control target key end

     0   :  { %8 = vsyncpa [#allocation3], 0  ;;  %s780_s0 = inlined_call_operand.hbm [shape: f32[2,2,4,256], index: 0, kind: input, shape index: {}]   ;;  %s781_s1 = inlined_call_operand.vmem [shape: f32[4,1], index: 1, kind: input, shape index: {}]   ;;  %s782_s2 = inlined_call_operand.vmem [shape: f32[4,1], index: 2, kind: input, shape index: {}]   ;;  %s783_s3 = inlined_call_operand.hbm [shape: f32[2,4,256], index: 3, kind: output, shape index: {}]  }
   0x1   :  { %10 = vsyncpa [#allocation3 + $0x1], 0 }
   0x2   :  { %11 = vsyncpa [#allocation4], 0 }
   0x3   :  { %13 = vsyncpa [#allocation4 + $0x1], 0  ;;  %s653_s12 = smov 0   ;;  %s655_s13 = smov 0  }
   0x4   :  { %s657_s14 = smov 0   ;;  %s659_s15 = smov 0  }
   0x5   :  { %s661_s16 = smov 0   ;;  %s663_s17 = smov 0  }
   0x6 LB: > { %s428_s18 = sadd.s32 4294967295, %s627_s17   ;;  %s429_s19 = sadd.s32 4294967294, %s627_s17   ;;  %s627_s17 = sphi %s663_s17, %s19_s17   ;;  %s623_s16 = sphi %s661_s16, %s792_s16   ;;  %s619_s15 = sphi %s659_s15, %s791_s15   ;;  %s615_s14 = sphi %s657_s14, %s790_s14   ;;  %s611_s13 = sphi %s655_s13, %s789_s13   ;;  %s607_s12 = sphi %s653_s12, %s788_s12  }
   0x7   : > { %s38_s20 = sadd.s32 1, %s623_s16  ;;  %s49_s21 = sadd.s32 1, %s615_s14 }
   0x8   : > { %p40_p0 = scmp.ge.s32.totalorder %s38_s20, 2  ;;  %p56_p1 = scmp.ne.s32.totalorder %s615_s14, %s611_s13 }
   0x9   : > { %p57_p2 = scmp.eq.s32.totalorder %s627_s17, 0  ;;  %p62_p3 = scmp.ne.s32.totalorder %s611_s13, %s607_s12 }
   0xa   : > { %s794_s20 = smov (%p40_p0, %s38_s20), 0  ;;  %p63_p5 = scmp.eq.s32.totalorder %s428_s18, 0 }
   0xb   : > { %p694_p4 = por %p57_p2, %p56_p1  ;;  %s42_s23 = ssub.s32 %s623_s16, %s794_s20 }
   0xc   : > { %p142_p6 = scmp.eq.s32.totalorder %s428_s18, 1  ;;  %p47_p7 = scmp.eq.s32.totalorder %s42_s23, 0 }
   0xd   : > { %p700_p8 = por %p63_p5, %p62_p3  ;;  %p148_p10 = scmp.eq.s32.totalorder %s429_s19, 1 }
   0xe   : > { %p704_p9 = por %p142_p6, %p56_p1  ;;  %p433_p12 = scmp.ge.s32.totalorder %s627_s17, 2 }
   0xf   : > { %s709_s26 = scalar_select %p47_p7, %s615_s14, %s49_s21  }
  0x10   : > { %p711_p11 = por %p148_p10, %p62_p3  ;;  %p460_p13 = scmp.lt.s32.totalorder %s627_s17, 2 }
  0x11   : > { %s182_s28 = sand.u32 1, %s615_s14   ;;  %s446_s30 = sshll.u32 %s623_s16, 4 }
  0x12   : > { %s434_s29 = sshll.u32 %s182_s28, 4  ;;  %s195_s6 = scalar_lea.hbm %s780_s0, %s446_s30 }
  0x13   : > { %s186_s7 = scalar_lea.vmem [#allocation2], %s434_s29  ;;  %s196_s9 = sshll.u32 %s195_s6, 4  ;;  %s197_s9 = int_to_ptr.hbm [resolvable:$true] %s196_s9 }
  0x14   : > { %s198_s8 = sshll.u32 %s186_s7, 4  ;;  %p453_p0 = pnand %p460_p13, %p694_p4  ;;  %s199_s8 = int_to_ptr.vmem [resolvable:$true] %s198_s8 }
  0x15   : > { %p437_p1 = scmp.ge.s32.totalorder %s627_s17, 1  ;;  %s183_s10 = scalar_lea.sflag [#allocation3], %s182_s28 }
  0x16   : > { %s629_s11 = smov 128   ;;  %s630_s18 = smov 8  }
  0x17   : > { %455 = dma.hbm_to_vmem [thread:$0]  (!%p453_p0), %s197_s9, 256, %s199_s8, %s183_s10, %s629_s11, %s629_s11, %s630_s18  }
  0x18   : > { %p206_p2 = scmp.lt.s32.totalorder %s627_s17, 3 }
  0x1a   : > { %p207_p3 = pnand %p437_p1, %p206_p2 }
  0x1b   : > { %s727_s19 = sand.u32 (!%p207_p3), 1, %s611_s13  }
  0x1c   : > { %210 = sbr.rel (%p207_p3) target bundleno = 166 (0xa6), region = 32  ;;  %s438_s21 = sshll.u32 (!%p207_p3), %s727_s19, 4 }
  0x1d   : > { %s213_s23 = scalar_lea.sflag (!%p207_p3), [#allocation3], %s727_s19  ;;  %s216_s29 = scalar_lea.vmem (!%p207_p3), [#allocation2], %s438_s21 }
  0x21   : > { %598 = dma.done.wait (%p700_p8), %s213_s23, 256  }
  0x22   : > { %600 = vsyncadd (%p700_p8), %s213_s23, 4294967040  ;;  %v631_v0 = vmov 0   ;;  %v263_v1 = vld [vmem:[%s781_s1] sm:$0xf]  ;;  %v632_v3 = vmov 839922192  }
  0x23   : > { %514 = vset.pattern.permute.xlu0 %v631_v0  ;;  %v274_v2 = vld [vmem:[%s782_s2] sm:$0xf]  ;;  %v269_v4 = vunpack.c.l.s4 %v632_v3  ;;  %v440_v6 = vld [vmem:[%s216_s29 + $0x8] sm:$0xff]  ;;  %s439_s24 = sshll.u32 %s727_s19, 3  ;;  %s447_s5 = sshll.u32 %s619_s15, 3 }
  0x24   : > { %266 = vperm.xlu0 %514, %v263_v1   ;;  %v258_v5 = vld [vmem:[%s216_s29] sm:$0xff]  ;;  %s302_s8 = scalar_lea.hbm %s783_s3, %s447_s5  ;;  %s247_s9 = scalar_lea.vmem [#allocation5], %s439_s24 }
  0x25   : > { %v270_v8 = vunpack.c.0.s8 %v269_v4  ;;  %v261_v9 = vsub.f32 %v258_v5, %v440_v6  ;;  %s304_s10 = sshll.u32 %s247_s9, 4  ;;  %s306_s11 = sshll.u32 %s302_s8, 4  ;;  %s305_s10 = int_to_ptr.vmem [resolvable:$true] %s304_s10  ;;  %s307_s11 = int_to_ptr.hbm [resolvable:$true] %s306_s11 }
  0x26   : > { %s287_s18 = scalar_lea.sflag [#allocation4], %s727_s19  ;;  %s559_s21 = sshra.s32 %s307_s11, 4  ;;  %s560_s21 = int_to_ptr.hbm [resolvable:$true] %s559_s21 }
  0x27   : > { %v262_v10 = vand.u32 2147483647, %v261_v9  ;;  %s561_s15 = scalar_lea.hbm %s560_s21, 8  ;;  %s565_s22 = scalar_lea.hbm %s783_s3, 16 }
  0x28   : > { %p562_p4 = scmp.ne.s32.totalorder %s560_s21, %s561_s15  ;;  %p566_p7 = scmp.lt.s32.totalorder %s560_s21, %s783_s3 }
  0x29   : > { %p567_p8 = scmp.lt.s32.totalorder %s565_s22, %s561_s15 }
  0x2a   : > { %p563_p5 = pnand %p562_p4, %p704_p9 }
  0x2b   : > { %p568_p10 = por %p567_p8, %p566_p7 }
  0x2c   : > { %277 = vperm.xlu0 %514, %v274_v2   ;;  %p564_p6 = pneg %p563_p5 }
  0x2e   : > { %p569_p13 = pnand %p568_p10, %p564_p6 }
  0x96   : > { %v267_v7 = vpop.permute.xlu0 %266 }
  0x97   : > { %v271_v11 = vperm.slane %v267_v7, %v270_v8 }
  0x99   : > { %v273_v13 = vmul.f32 %v271_v11, %v262_v10 }
  0x9e   : > { %v278_v12 = vpop.permute.xlu0 %277 }
  0x9f   : > { %v282_v14 = vperm.slane %v278_v12, %v270_v8 }
  0xa1   : > { %v284_v15 = vadd.f32 %v282_v14, %v273_v13 }
  0xa3   : > { %285 = vst [vmem:[%s247_s9] sm:$0xff] %v284_v15 }
  0xa4   : > { %572 = shalt.err (!%p569_p13)
}
  0xa5   : > { %450 = dma.vmem_to_hbm [thread:$0]  (%p704_p9), %s305_s10, 128, %s307_s11, %s287_s18  }
  0xa6 PF: > { %s318_s19 = sand.u32 1, %s607_s12   ;;  %p457_p0 = pnand %p433_p12, %p711_p11 }
  0xa7   : > { %s319_s4 = scalar_lea.sflag [#allocation4], %s318_s19 }
  0xa8   : > { %p458_p1 = pneg %p457_p0 }
  0xaa   : > { %602 = dma.done.wait (%p458_p1), %s319_s4, 128  }
  0xab   : > { %604 = vsyncadd (%p458_p1), %s319_s4, 4294967168  ;;  %s19_s17 = sadd.s32 1, %s627_s17   ;;  %s788_s12 = smov %s611_s13 }
  0xac   : > { %p16_p2 = scmp.ge.s32.totalorder %s19_s17, 4   ;;  %s789_s13 = smov %s615_s14 }
  0xad   : > { %s790_s14 = smov %s709_s26  ;;  %s791_s15 = smov %s623_s16 }
  0xae   : > { %s792_s16 = smov %s794_s20  ;;  %18 = sbr.rel (!%p16_p2) target bundleno = 6 (0x6), region = 84 }
  0xb3   :  { %325 = vsyncpa [#allocation3], 1 }
  0xb4   :  { %327 = vsyncpa [#allocation3 + $0x1], 1 }
  0xb5   :  { %328 = vsyncpa [#allocation4], 1 }
  0xb6   :  { %330 = vsyncpa [#allocation4 + $0x1], 1 }

</bundles_post_ra>
